<compile_context>
chip_gen: v6e
topology: v6e:2x2x1
jax: 0.10.0
libtpu: 0.0.40
codegen_flags: <defaults>
</compile_context>

<pallas_src>
import jax
import jax.numpy as jnp
from jax.experimental import pallas as pl
from jax.experimental.pallas import tpu as pltpu

_H1, _H2 = 512, 256      # hidden sizes fixed by the module
_OUT_PAD = 128           # 1-wide head padded to 128 lanes for lane-dense stores


def _round_up(n, m):
    return ((n + m - 1) // m) * m


def _mlp_kernel(x_ref, w1_ref, b1_ref, w2_ref, b2_ref, w3_ref, b3_ref, o_ref):
    # f32 x tile -> bf16 MXU input (VPU cast, hidden under the matmul).
    x = x_ref[...].astype(jnp.bfloat16)
    # Layer 1: Linear(2*input_dim, 512) + ReLU   (Dropout -> identity at eval)
    h1 = jnp.dot(x, w1_ref[...], preferred_element_type=jnp.float32)
    h1 = jnp.maximum(h1 + b1_ref[...], 0.0).astype(jnp.bfloat16)   # fused downcast
    # Layer 2: Linear(512, 256) + ReLU           (Dropout -> identity at eval)
    h2 = jnp.dot(h1, w2_ref[...], preferred_element_type=jnp.float32)
    h2 = jnp.maximum(h2 + b2_ref[...], 0.0).astype(jnp.bfloat16)   # fused downcast
    # Layer 3: Linear(256, 1) + Sigmoid; N zero-padded to 128 lanes so the MXU
    # column block is full and the (tile_b, 128) store is unmasked / lane-dense.
    logits = jnp.dot(h2, w3_ref[...], preferred_element_type=jnp.float32)
    o_ref[...] = jax.nn.sigmoid(logits + b3_ref[...]).astype(o_ref.dtype)


def similarity_predictor(x, params, *, tile_b=512):
    """x: [B, 2*input_dim]. Returns [B, 1] float32 in (0, 1)."""
    w1, b1, w2, b2, w3, b3 = params
    B, F = x.shape
    assert w1.shape == (F, _H1) and w2.shape == (_H1, _H2) and w3.shape == (_H2, 1)

    # Tile selection: one exact (B, F) block for small batches (zero padding),
    # otherwise a large 16-aligned tile with a single partial edge block.
    if B <= tile_b:
        tile_b = B
    else:
        tile_b = max(16, _round_up(int(tile_b), 16))
    grid_b = pl.cdiv(B, tile_b)   # >= 2 steps at large B -> shards over v7x's 2 TCs

    # Weights in bf16 (f32 accumulation happens inside the kernel); biases f32.
    w1b = w1.astype(jnp.bfloat16)
    w2b = w2.astype(jnp.bfloat16)
    w3b = jnp.zeros((_H2, _OUT_PAD), jnp.bfloat16).at[:, :1].set(
        w3.astype(jnp.bfloat16))
    b1f = b1.astype(jnp.float32).reshape(1, _H1)
    b2f = b2.astype(jnp.float32).reshape(1, _H2)
    b3p = jnp.zeros((1, _OUT_PAD), jnp.float32).at[:, :1].set(
        b3.astype(jnp.float32).reshape(1, 1))

    # VMEM budget: double-buffered x / out tiles, resident weights (counted
    # double-buffered to be safe), h1/h2 temporaries, slack.
    vmem_bytes = (
        2 * tile_b * F * 4                                    # x tiles (f32)
        + 2 * (F * _H1 + _H1 * _H2 + _H2 * _OUT_PAD) * 2      # weights (bf16)
        + 2 * tile_b * _OUT_PAD * 2                           # out tiles (bf16)
        + tile_b * (_H1 + _H2) * 4                            # h1/h2 temporaries
        + (2 << 20)                                           # slack
    )
    try:
        # Generation-aware cap: ~75% of physical VMEM (v7x has only 64 MiB/TC).
        vmem_cap = int(pltpu.get_tpu_info().vmem_capacity_bytes) * 3 // 4
    except Exception:
        vmem_cap = 48 << 20
    vmem_limit = int(min(max(vmem_bytes, 16 << 20), vmem_cap))

    rows = grid_b * tile_b        # rows actually computed (incl. edge padding)
    flops = 2 * rows * (F * _H1 + _H1 * _H2 + _H2 * _OUT_PAD)
    bytes_accessed = (B * F * 4
                      + (w1b.size + w2b.size + w3b.size) * 2
                      + (b1f.size + b2f.size + b3p.size) * 4
                      + B * _OUT_PAD * 2)
    cost = pl.CostEstimate(flops=flops,
                           transcendentals=rows * _OUT_PAD,
                           bytes_accessed=bytes_accessed)

    out = pl.pallas_call(
        _mlp_kernel,
        out_shape=jax.ShapeDtypeStruct((B, _OUT_PAD), jnp.bfloat16),
        grid_spec=pltpu.PrefetchScalarGridSpec(
            num_scalar_prefetch=0,
            grid=(grid_b,),
            in_specs=[
                pl.BlockSpec((tile_b, F), lambda i: (i, 0)),      # x tile (f32)
                # Weights/biases: constant index_map -> DMA'd once, VMEM-resident.
                pl.BlockSpec((F, _H1), lambda i: (0, 0)),         # w1
                pl.BlockSpec((1, _H1), lambda i: (0, 0)),         # b1
                pl.BlockSpec((_H1, _H2), lambda i: (0, 0)),       # w2
                pl.BlockSpec((1, _H2), lambda i: (0, 0)),         # b2
                pl.BlockSpec((_H2, _OUT_PAD), lambda i: (0, 0)),  # w3 (padded)
                pl.BlockSpec((1, _OUT_PAD), lambda i: (0, 0)),    # b3 (padded)
            ],
            out_specs=pl.BlockSpec((tile_b, _OUT_PAD), lambda i: (i, 0)),
        ),
        compiler_params=pltpu.CompilerParams(
            dimension_semantics=("parallel",),
            vmem_limit_bytes=vmem_limit),
        cost_estimate=cost,
    )(x, w1b, b1f, w2b, b2f, w3b, b3p)

    # Column 0 of the lane-padded block is the real 1-wide output.
    # Edge-block rows beyond B are never written (masked), so no batch slicing
    # is needed; never consume the padded lanes elsewhere.
    return out[:, :1].astype(jnp.float32)


def init_params(key, input_dim):
    """Deterministic PyTorch-style (uniform +/- 1/sqrt(fan_in)) init, f32."""
    dims = [(input_dim * 2, _H1), (_H1, _H2), (_H2, 1)]
    params = []
    for fan_in, fan_out in dims:
        key, kw, kb = jax.random.split(key, 3)
        bound = 1.0 / jnp.sqrt(fan_in)
        w = jax.random.uniform(kw, (fan_in, fan_out), jnp.float32, -bound, bound)
        b = jax.random.uniform(kb, (1, fan_out), jnp.float32, -bound, bound)
        params += [w, b]
    return tuple(params)


def reference(x, params):
    w1, b1, w2, b2, w3, b3 = params
    h1 = jnp.maximum(x @ w1 + b1, 0.0)
    h2 = jnp.maximum(h1 @ w2 + b2, 0.0)
    return jax.nn.sigmoid(h2 @ w3 + b3)


if __name__ == "__main__":
    # Small shapes consistent with the module: hidden sizes 512/256/1 are fixed
    # by the model; input_dim is a constructor arg, so use a small one here.
    input_dim = 64            # -> x has 2*input_dim = 128 features
    batch = 80                # not a multiple of the tiles used below

    key = jax.random.PRNGKey(0)
    key, kx = jax.random.split(key)
    x = jax.random.normal(kx, (batch, input_dim * 2), jnp.float32)
    params = init_params(key, input_dim)

    ref = reference(x, params)

    # 1) Default path: single exact (B, F) block, zero padding.
    out = jax.block_until_ready(similarity_predictor(x, params))
    assert out.shape == (batch, 1) and out.dtype == jnp.float32
    err = float(jnp.max(jnp.abs(out - ref)))
    assert jnp.allclose(out, ref, atol=2e-2, rtol=2e-2), err

    # 2) Multi-step grid with a partial edge block (exercises masked writeback).
    out2 = jax.block_until_ready(similarity_predictor(x, params, tile_b=32))
    err2 = float(jnp.max(jnp.abs(out2 - ref)))
    assert jnp.allclose(out2, ref, atol=2e-2, rtol=2e-2), err2

    print("KERNEL_OK")
</pallas_src>

<mosaic_0001>
module attributes {stable_mosaic.version = 11 : i64} {
  func.func @_mlp_kernel(%arg0: i32, %arg1: memref<80x128xf32, #tpu.memory_space<vmem>>, %arg2: memref<128x512xbf16, #tpu.memory_space<vmem>>, %arg3: memref<1x512xf32, #tpu.memory_space<vmem>>, %arg4: memref<512x256xbf16, #tpu.memory_space<vmem>>, %arg5: memref<1x256xf32, #tpu.memory_space<vmem>>, %arg6: memref<256x128xbf16, #tpu.memory_space<vmem>>, %arg7: memref<1x128xf32, #tpu.memory_space<vmem>>, %arg8: memref<80x128xbf16, #tpu.memory_space<vmem>>) attributes {dimension_semantics = [#tpu.dimension_semantics<parallel>], iteration_bounds = array<i64: 1>, scalar_prefetch = 0 : i64, scratch_operands = 0 : i64, tpu.core_type = #tpu.core_type<tc>, window_params = [{transform_indices = @transform_0, window_bounds = array<i64: 80, 128>}, {pipeline_mode = #tpu.pipeline_mode<synchronous>, transform_indices = @transform_1, window_bounds = array<i64: 128, 512>}, {pipeline_mode = #tpu.pipeline_mode<synchronous>, transform_indices = @transform_2, window_bounds = array<i64: 1, 512>}, {pipeline_mode = #tpu.pipeline_mode<synchronous>, transform_indices = @transform_3, window_bounds = array<i64: 512, 256>}, {pipeline_mode = #tpu.pipeline_mode<synchronous>, transform_indices = @transform_4, window_bounds = array<i64: 1, 256>}, {pipeline_mode = #tpu.pipeline_mode<synchronous>, transform_indices = @transform_5, window_bounds = array<i64: 256, 128>}, {pipeline_mode = #tpu.pipeline_mode<synchronous>, transform_indices = @transform_6, window_bounds = array<i64: 1, 128>}, {transform_indices = @transform_7, window_bounds = array<i64: 80, 128>}]} {
    %c0 = arith.constant 0 : index
    %c0_0 = arith.constant 0 : index
    %0 = vector.load %arg1[%c0, %c0_0] : memref<80x128xf32, #tpu.memory_space<vmem>>, vector<80x128xf32>
    %1 = arith.truncf %0 : vector<80x128xf32> to vector<80x128xbf16>
    %c0_1 = arith.constant 0 : index
    %c0_2 = arith.constant 0 : index
    %2 = vector.load %arg2[%c0_1, %c0_2] : memref<128x512xbf16, #tpu.memory_space<vmem>>, vector<128x512xbf16>
    %cst = arith.constant dense<0.000000e+00> : vector<80x512xf32>
    %3 = tpu.matmul %1, %2, %cst {dimension_numbers = #tpu.dot_dimension_numbers<[1], [0], [0], [1], [0, 0, 1, 1], [], []>} : vector<80x128xbf16>, vector<128x512xbf16>, vector<80x512xf32> -> vector<80x512xf32>
    %c0_3 = arith.constant 0 : index
    %c0_4 = arith.constant 0 : index
    %4 = vector.load %arg3[%c0_3, %c0_4] : memref<1x512xf32, #tpu.memory_space<vmem>>, vector<1x512xf32>
    %5 = vector.broadcast %4 : vector<1x512xf32> to vector<80x512xf32>
    %6 = arith.addf %3, %5 : vector<80x512xf32>
    %cst_5 = arith.constant 0.000000e+00 : f32
    %7 = vector.broadcast %cst_5 : f32 to vector<80x512xf32>
    %8 = arith.maximumf %6, %7 : vector<80x512xf32>
    %9 = arith.truncf %8 : vector<80x512xf32> to vector<80x512xbf16>
    %c0_6 = arith.constant 0 : index
    %c0_7 = arith.constant 0 : index
    %10 = vector.load %arg4[%c0_6, %c0_7] : memref<512x256xbf16, #tpu.memory_space<vmem>>, vector<512x256xbf16>
    %cst_8 = arith.constant dense<0.000000e+00> : vector<80x256xf32>
    %11 = tpu.matmul %9, %10, %cst_8 {dimension_numbers = #tpu.dot_dimension_numbers<[1], [0], [0], [1], [0, 0, 1, 1], [], []>} : vector<80x512xbf16>, vector<512x256xbf16>, vector<80x256xf32> -> vector<80x256xf32>
    %c0_9 = arith.constant 0 : index
    %c0_10 = arith.constant 0 : index
    %12 = vector.load %arg5[%c0_9, %c0_10] : memref<1x256xf32, #tpu.memory_space<vmem>>, vector<1x256xf32>
    %13 = vector.broadcast %12 : vector<1x256xf32> to vector<80x256xf32>
    %14 = arith.addf %11, %13 : vector<80x256xf32>
    %cst_11 = arith.constant 0.000000e+00 : f32
    %15 = vector.broadcast %cst_11 : f32 to vector<80x256xf32>
    %16 = arith.maximumf %14, %15 : vector<80x256xf32>
    %17 = arith.truncf %16 : vector<80x256xf32> to vector<80x256xbf16>
    %c0_12 = arith.constant 0 : index
    %c0_13 = arith.constant 0 : index
    %18 = vector.load %arg6[%c0_12, %c0_13] : memref<256x128xbf16, #tpu.memory_space<vmem>>, vector<256x128xbf16>
    %cst_14 = arith.constant dense<0.000000e+00> : vector<80x128xf32>
    %19 = tpu.matmul %17, %18, %cst_14 {dimension_numbers = #tpu.dot_dimension_numbers<[1], [0], [0], [1], [0, 0, 1, 1], [], []>} : vector<80x256xbf16>, vector<256x128xbf16>, vector<80x128xf32> -> vector<80x128xf32>
    %c0_15 = arith.constant 0 : index
    %c0_16 = arith.constant 0 : index
    %20 = vector.load %arg7[%c0_15, %c0_16] : memref<1x128xf32, #tpu.memory_space<vmem>>, vector<1x128xf32>
    %21 = vector.broadcast %20 : vector<1x128xf32> to vector<80x128xf32>
    %22 = arith.addf %19, %21 : vector<80x128xf32>
    %23 = arith.negf %22 : vector<80x128xf32>
    %24 = math.exp %23 : vector<80x128xf32>
    %cst_17 = arith.constant 1.000000e+00 : f32
    %25 = vector.broadcast %cst_17 : f32 to vector<80x128xf32>
    %26 = arith.addf %25, %24 : vector<80x128xf32>
    %27 = arith.divf %25, %26 : vector<80x128xf32>
    %28 = arith.truncf %27 : vector<80x128xf32> to vector<80x128xbf16>
    %c0_18 = arith.constant 0 : index
    %c0_19 = arith.constant 0 : index
    %29 = vector.load %arg8[%c0_18, %c0_19] : memref<80x128xbf16, #tpu.memory_space<vmem>>, vector<80x128xbf16>
    tpu.vector_store %arg8[%c0_18, %c0_19], %28 {strides = array<i32>} : memref<80x128xbf16, #tpu.memory_space<vmem>>, vector<80x128xbf16>,
    return
  }
  func.func @transform_0(%arg0: i32) -> (i32, i32) {
    %c0_i32 = arith.constant 0 : i32
    %c0_i32_0 = arith.constant 0 : i32
    return %arg0, %c0_i32 : i32, i32
  }
  func.func @transform_1(%arg0: i32) -> (i32, i32) {
    %c0_i32 = arith.constant 0 : i32
    %c0_i32_0 = arith.constant 0 : i32
    %c0_i32_1 = arith.constant 0 : i32
    return %c0_i32, %c0_i32_0 : i32, i32
  }
  func.func @transform_2(%arg0: i32) -> (i32, i32) {
    %c0_i32 = arith.constant 0 : i32
    %c0_i32_0 = arith.constant 0 : i32
    %c0_i32_1 = arith.constant 0 : i32
    return %c0_i32, %c0_i32_0 : i32, i32
  }
  func.func @transform_3(%arg0: i32) -> (i32, i32) {
    %c0_i32 = arith.constant 0 : i32
    %c0_i32_0 = arith.constant 0 : i32
    %c0_i32_1 = arith.constant 0 : i32
    return %c0_i32, %c0_i32_0 : i32, i32
  }
  func.func @transform_4(%arg0: i32) -> (i32, i32) {
    %c0_i32 = arith.constant 0 : i32
    %c0_i32_0 = arith.constant 0 : i32
    %c0_i32_1 = arith.constant 0 : i32
    return %c0_i32, %c0_i32_0 : i32, i32
  }
  func.func @transform_5(%arg0: i32) -> (i32, i32) {
    %c0_i32 = arith.constant 0 : i32
    %c0_i32_0 = arith.constant 0 : i32
    %c0_i32_1 = arith.constant 0 : i32
    return %c0_i32, %c0_i32_0 : i32, i32
  }
  func.func @transform_6(%arg0: i32) -> (i32, i32) {
    %c0_i32 = arith.constant 0 : i32
    %c0_i32_0 = arith.constant 0 : i32
    %c0_i32_1 = arith.constant 0 : i32
    return %c0_i32, %c0_i32_0 : i32, i32
  }
  func.func @transform_7(%arg0: i32) -> (i32, i32) {
    %c0_i32 = arith.constant 0 : i32
    %c0_i32_0 = arith.constant 0 : i32
    return %arg0, %c0_i32 : i32, i32
  }
}

</mosaic_0001>

<bundles_post_ra>
// kernel: tpu_custom_call.1
= control target key start
LH: loop header
LB: loop body
LE: loop exit
PB: predicated region body
PF: predicated region fallthrough
CT: control target
= control target key end

     0   :  { %12 = vsyncpa [#allocation3], 0  ;;  %s2244_s0 = inlined_call_operand.hbm [shape: f32[80,128], index: 0, kind: input, shape index: {}]   ;;  %s2245_s1 = inlined_call_operand.hbm [shape: bf16[128,512], index: 1, kind: input, shape index: {}]   ;;  %s2246_s2 = inlined_call_operand.hbm [shape: f32[1,512], index: 2, kind: input, shape index: {}]   ;;  %s2247_s3 = inlined_call_operand.hbm [shape: bf16[512,256], index: 3, kind: input, shape index: {}]   ;;  %s2248_s4 = inlined_call_operand.vmem [shape: f32[1,256], index: 4, kind: input, shape index: {}]   ;;  %s2249_s5 = inlined_call_operand.hbm [shape: bf16[256,128], index: 5, kind: input, shape index: {}]   ;;  %s2250_s6 = inlined_call_operand.vmem [shape: f32[1,128], index: 6, kind: input, shape index: {}]   ;;  %s2251_s7 = inlined_call_operand.hbm [shape: bf16[80,128], index: 7, kind: output, shape index: {}]  }
   0x1   :  { %13 = vsyncpa [#allocation6], 0 }
   0x2   :  { %14 = vsyncpa [#allocation9], 0 }
   0x3   :  { %15 = vsyncpa [#allocation4], 0  ;;  %s2053_s24 = smov [#allocation5]  }
   0x4   :  { %s33_s25 = sshll.u32 %s2053_s24, 4  ;;  %s34_s25 = int_to_ptr.vmem [resolvable:$true] %s33_s25 }
   0x5   :  { %s1933_s26 = scalar_lea.vmem %s34_s25, 4096  ;;  %p1938_p1 = scmp.lt.s32.totalorder %s34_s25, %s34_s25 }
   0x6   :  { %p1934_p0 = scmp.ne.s32.totalorder %s34_s25, %s1933_s26  ;;  %p1939_p2 = scmp.lt.s32.totalorder %s1933_s26, %s1933_s26 }
   0x8   :  { %p1940_p3 = por %p1939_p2, %p1938_p1 }
   0xa   :  { %p1941_p4 = pnand %p1940_p3, %p1934_p0 }
   0xc   :  { %1944 = shalt.err (!%p1941_p4)
}
   0xd   :  { %s2054_s27 = smov 256   ;;  %s2055_s28 = smov 16  }
   0xe   :  { %39 = dma.hbm_to_vmem [thread:$0]  %s2245_s1, 4096, %s34_s25, [#allocation6], %s2054_s27, %s2054_s27, %s2055_s28  }
   0xf   :  { %s2056_s8 = smov [#allocation8]   ;;  %s2057_s10 = smov [#allocation2]  }
  0x10   :  { %s55_s9 = sshll.u32 %s2056_s8, 4  ;;  %s21_s11 = sshll.u32 %s2057_s10, 4  ;;  %s56_s9 = int_to_ptr.vmem [resolvable:$true] %s55_s9  ;;  %s22_s11 = int_to_ptr.vmem [resolvable:$true] %s21_s11 }
  0x11   :  { %s1953_s12 = scalar_lea.vmem %s56_s9, 8192  ;;  %p1958_p6 = scmp.lt.s32.totalorder %s56_s9, %s56_s9 }
  0x12   :  { %p1954_p5 = scmp.ne.s32.totalorder %s56_s9, %s1953_s12  ;;  %p1959_p7 = scmp.lt.s32.totalorder %s1953_s12, %s1953_s12 }
  0x14   :  { %p1960_p8 = por %p1959_p7, %p1958_p6 }
  0x16   :  { %p1961_p9 = pnand %p1960_p8, %p1954_p5 }
  0x18   :  { %1964 = shalt.err (!%p1961_p9)
}
  0x19   :  { %s2058_s13 = smov 128   ;;  %s2059_s14 = smov 8  }
  0x1a   :  { %61 = dma.hbm_to_vmem [thread:$0]  %s2247_s3, 8192, %s56_s9, [#allocation9], %s2058_s13, %s2058_s13, %s2059_s14  }
  0x1b   :  { %s1973_s1 = scalar_lea.vmem %s22_s11, 1280  ;;  %p1978_p11 = scmp.lt.s32.totalorder %s22_s11, %s22_s11 }
  0x1c   :  { %p1974_p10 = scmp.ne.s32.totalorder %s22_s11, %s1973_s1  ;;  %p1979_p12 = scmp.lt.s32.totalorder %s1973_s1, %s1973_s1 }
  0x1e   :  { %p1980_p13 = por %p1979_p12, %p1978_p11 }
  0x20   :  { %p1981_p0 = pnand %p1980_p13, %p1974_p10 }
  0x22   :  { %1984 = shalt.err (!%p1981_p0)
}
  0x23   :  { %27 = dma.hbm_to_vmem [thread:$0]  %s2244_s0, 1280, %s22_s11, [#allocation3], %s2058_s13, %s2058_s13, %s2059_s14  }
  0x24   :  { %s2060_s19 = smov [#allocation7]   ;;  %s2061_s21 = smov [#allocation10]  }
  0x25   :  { %s46_s20 = sshll.u32 %s2060_s19, 4  ;;  %s69_s22 = sshll.u32 %s2061_s21, 4  ;;  %s47_s20 = int_to_ptr.vmem [resolvable:$true] %s46_s20  ;;  %s70_s22 = int_to_ptr.vmem [resolvable:$true] %s69_s22 }
  0x26   :  { %s1993_s23 = scalar_lea.vmem %s47_s20, 64  ;;  %p1998_p2 = scmp.lt.s32.totalorder %s47_s20, %s47_s20 }
  0x27   :  { %p1994_p1 = scmp.ne.s32.totalorder %s47_s20, %s1993_s23  ;;  %p1999_p3 = scmp.lt.s32.totalorder %s1993_s23, %s1993_s23 }
  0x29   :  { %p2000_p4 = por %p1999_p3, %p1998_p2 }
  0x2b   :  { %p2001_p5 = pnand %p2000_p4, %p1994_p1 }
  0x2d   :  { %2004 = shalt.err (!%p2001_p5)
}
  0x2e   :  { %49 = dma.hbm_to_vmem [thread:$0]  %s2246_s2, 64, %s47_s20, [#allocation6]  }
  0x2f   :  { %s2013_s25 = scalar_lea.vmem %s70_s22, 2048  ;;  %p2018_p7 = scmp.lt.s32.totalorder %s70_s22, %s70_s22 }
  0x30   :  { %p2014_p6 = scmp.ne.s32.totalorder %s70_s22, %s2013_s25  ;;  %p2019_p8 = scmp.lt.s32.totalorder %s2013_s25, %s2013_s25 }
  0x32   :  { %p2020_p9 = por %p2019_p8, %p2018_p7 }
  0x34   :  { %p2021_p10 = pnand %p2020_p9, %p2014_p6 }
  0x36   :  { %2024 = shalt.err (!%p2021_p10)
}
  0x37   :  { %s2062_s0 = smov 64   ;;  %s2063_s26 = smov 4  }
  0x38   :  { %75 = dma.hbm_to_vmem [thread:$0]  %s2249_s5, 2048, %s70_s22, [#allocation9], %s2062_s0, %s2062_s0, %s2063_s26  }
  0x39   :  { %2045 = dma.done.wait [#allocation3], 1280  }
  0x3a   :  { %2046 = vsyncadd [#allocation3], 4294966016 }
  0x3b   :  { %2047 = dma.done.wait [#allocation6], 4160  }
  0x3c   :  { %2048 = vsyncadd [#allocation6], 4294963136 }
  0x3d   :  { %2049 = dma.done.wait [#allocation9], 10240  }
  0x3e   :  { %2050 = vsyncadd [#allocation9], 4294957056  ;;  %v2064_v0 = vmov 0   ;;  %v1725_v1 = vld [vmem:[#allocation5 + $0xe4] ss:$16 sps:$4 sm:$0xff]   ;;  %v95_v34 = vld [vmem:[#allocation2 + $0x8] sm:$0xff] }
  0x3f   :  { %355 = vmatprep.mubr.bf16.mxu0 %v2064_v0  ;;  %438 = vmatprep.mubr.bf16.mxu1 %v2064_v0  ;;  %v1727_v2 = vld [vmem:[#allocation5 + $0xec] ss:$16 sps:$4 sm:$0xff]   ;;  %v1729_v3 = vld [vmem:[#allocation5 + $0xe0] ss:$16 sps:$4 sm:$0xff]   ;;  %v1730_v4 = vld [vmem:[#allocation5 + $0xe8] ss:$16 sps:$4 sm:$0xff]  }
  0x40   :  { %323 = vmatprep.subr.bf16.mxu0 %v1725_v1  ;;  %406 = vmatprep.subr.bf16.mxu1 %v1727_v2  ;;  %v1731_v5 = vld [vmem:[#allocation5 + $0xc4] ss:$16 sps:$4 sm:$0xff]   ;;  %v1733_v6 = vld [vmem:[#allocation5 + $0xcc] ss:$16 sps:$4 sm:$0xff]   ;;  %v1735_v7 = vld [vmem:[#allocation5 + $0xc0] ss:$16 sps:$4 sm:$0xff]  }
  0x41   :  { %324 = vmatpush1.bf16.msra.mxu0 %v1729_v3  ;;  %407 = vmatpush1.bf16.msra.mxu1 %v1730_v4  ;;  %v1736_v8 = vld [vmem:[#allocation5 + $0xc8] ss:$16 sps:$4 sm:$0xff]   ;;  %v1737_v9 = vld [vmem:[#allocation5 + $0xa4] ss:$16 sps:$4 sm:$0xff]   ;;  %v1739_v10 = vld [vmem:[#allocation5 + $0xac] ss:$16 sps:$4 sm:$0xff]  }
  0x42   :  { %325 = vmatprep.subr.bf16.mxu0 %v1731_v5  ;;  %408 = vmatprep.subr.bf16.mxu1 %v1733_v6  ;;  %v1741_v11 = vld [vmem:[#allocation5 + $0xa0] ss:$16 sps:$4 sm:$0xff]   ;;  %v1742_v12 = vld [vmem:[#allocation5 + $0xa8] ss:$16 sps:$4 sm:$0xff]   ;;  %v1743_v13 = vld [vmem:[#allocation5 + $0x84] ss:$16 sps:$4 sm:$0xff]  }
  0x43   :  { %v1745_v14 = vld [vmem:[#allocation5 + $0x8c] ss:$16 sps:$4 sm:$0xff]   ;;  %v1747_v15 = vld [vmem:[#allocation5 + $0x80] ss:$16 sps:$4 sm:$0xff]   ;;  %v1748_v16 = vld [vmem:[#allocation5 + $0x88] ss:$16 sps:$4 sm:$0xff]  }
  0x44   :  { %v1749_v17 = vld [vmem:[#allocation5 + $0x64] ss:$16 sps:$4 sm:$0xff]   ;;  %v1751_v18 = vld [vmem:[#allocation5 + $0x6c] ss:$16 sps:$4 sm:$0xff]   ;;  %v1753_v19 = vld [vmem:[#allocation5 + $0x60] ss:$16 sps:$4 sm:$0xff]  }
  0x45   :  { %326 = vmatpush1.bf16.msra.mxu0 %v1735_v7  ;;  %409 = vmatpush1.bf16.msra.mxu1 %v1736_v8  ;;  %v1754_v20 = vld [vmem:[#allocation5 + $0x68] ss:$16 sps:$4 sm:$0xff]   ;;  %v1755_v21 = vld [vmem:[#allocation5 + $0x44] ss:$16 sps:$4 sm:$0xff]   ;;  %v1757_v22 = vld [vmem:[#allocation5 + $0x4c] ss:$16 sps:$4 sm:$0xff]  }
  0x46   :  { %327 = vmatprep.subr.bf16.mxu0 %v1737_v9  ;;  %410 = vmatprep.subr.bf16.mxu1 %v1739_v10  ;;  %v1759_v23 = vld [vmem:[#allocation5 + $0x40] ss:$16 sps:$4 sm:$0xff]   ;;  %v1760_v24 = vld [vmem:[#allocation5 + $0x48] ss:$16 sps:$4 sm:$0xff]   ;;  %v1761_v25 = vld [vmem:[#allocation5 + $0x24] ss:$16 sps:$4 sm:$0xff]  }
  0x47   :  { %v1763_v26 = vld [vmem:[#allocation5 + $0x2c] ss:$16 sps:$4 sm:$0xff]   ;;  %v1765_v27 = vld [vmem:[#allocation5 + $0x20] ss:$16 sps:$4 sm:$0xff]   ;;  %v1766_v28 = vld [vmem:[#allocation5 + $0x28] ss:$16 sps:$4 sm:$0xff]  }
  0x48   :  { %v1767_v29 = vld [vmem:[#allocation5 + $0x4] ss:$16 sps:$4 sm:$0xff]   ;;  %v1769_v30 = vld [vmem:[#allocation5 + $0xc] ss:$16 sps:$4 sm:$0xff]   ;;  %v1771_v31 = vld [vmem:[#allocation5] ss:$16 sps:$4 sm:$0xff]  }
  0x49   :  { %328 = vmatpush1.bf16.msra.mxu0 %v1741_v11  ;;  %411 = vmatpush1.bf16.msra.mxu1 %v1742_v12  ;;  %v1772_v32 = vld [vmem:[#allocation5 + $0x8] ss:$16 sps:$4 sm:$0xff]   ;;  %v94_v33 = vld [vmem:[#allocation2] sm:$0xff]  ;;  %v96_v42 = vld [vmem:[#allocation2 + $0x10] sm:$0xff] }
  0x4a   :  { %329 = vmatprep.subr.bf16.mxu0 %v1743_v13  ;;  %412 = vmatprep.subr.bf16.mxu1 %v1745_v14  ;;  %v1775_v35 = vld [vmem:[#allocation8 + $0x74] ss:$8 sps:$4 sm:$0xff]   ;;  %v104_v37 = vpack.c.bf16 %v95_v34, %v94_v33  ;;  %v1773_v38 = vld [vmem:[#allocation8 + $0x70] ss:$8 sps:$4 sm:$0xff]   ;;  %v1781_v40 = vld [vmem:[#allocation8 + $0x64] ss:$8 sps:$4 sm:$0xff]  }
  0x4b   :  { %v1778_v36 = vld [vmem:[#allocation8 + $0x174] ss:$8 sps:$4 sm:$0xff]   ;;  %v1776_v39 = vld [vmem:[#allocation8 + $0x170] ss:$8 sps:$4 sm:$0xff]   ;;  %v1784_v41 = vld [vmem:[#allocation8 + $0x164] ss:$8 sps:$4 sm:$0xff]  }
  0x4c   :  { %v97_v43 = vld [vmem:[#allocation2 + $0x18] sm:$0xff]  ;;  %v1787_v46 = vld [vmem:[#allocation8 + $0x54] ss:$8 sps:$4 sm:$0xff]   ;;  %v1785_v49 = vld [vmem:[#allocation8 + $0x50] ss:$8 sps:$4 sm:$0xff]  }
  0x4d   :  { %330 = vmatpush1.bf16.msra.mxu0 %v1747_v15  ;;  %413 = vmatpush1.bf16.msra.mxu1 %v1748_v16  ;;  %v1779_v44 = vld [vmem:[#allocation8 + $0x60] ss:$8 sps:$4 sm:$0xff]   ;;  %v1790_v47 = vld [vmem:[#allocation8 + $0x154] ss:$8 sps:$4 sm:$0xff]   ;;  %v105_v48 = vpack.c.bf16 %v97_v43, %v96_v42  ;;  %v1788_v50 = vld [vmem:[#allocation8 + $0x150] ss:$8 sps:$4 sm:$0xff]  }
  0x4e   :  { %331 = vmatprep.subr.bf16.mxu0 %v1749_v17  ;;  %414 = vmatprep.subr.bf16.mxu1 %v1751_v18  ;;  %v1782_v45 = vld [vmem:[#allocation8 + $0x160] ss:$8 sps:$4 sm:$0xff]   ;;  %v1793_v51 = vld [vmem:[#allocation8 + $0x44] ss:$8 sps:$4 sm:$0xff]   ;;  %v99_v54 = vld [vmem:[#allocation2 + $0x28] sm:$0xff] }
  0x4f   :  { %v1796_v52 = vld [vmem:[#allocation8 + $0x144] ss:$8 sps:$4 sm:$0xff]   ;;  %v1791_v55 = vld [vmem:[#allocation8 + $0x40] ss:$8 sps:$4 sm:$0xff]   ;;  %v1799_v57 = vld [vmem:[#allocation8 + $0x34] ss:$8 sps:$4 sm:$0xff]  }
  0x50   :  { %v98_v53 = vld [vmem:[#allocation2 + $0x20] sm:$0xff]  ;;  %v1794_v56 = vld [vmem:[#allocation8 + $0x140] ss:$8 sps:$4 sm:$0xff]   ;;  %v1802_v58 = vld [vmem:[#allocation8 + $0x134] ss:$8 sps:$4 sm:$0xff]  }
  0x51   :  { %332 = vmatpush1.bf16.msra.mxu0 %v1753_v19  ;;  %415 = vmatpush1.bf16.msra.mxu1 %v1754_v20  ;;  %v106_v59 = vpack.c.bf16 %v99_v54, %v98_v53  ;;  %v1797_v60 = vld [vmem:[#allocation8 + $0x30] ss:$8 sps:$4 sm:$0xff]   ;;  %v1805_v62 = vld [vmem:[#allocation8 + $0x24] ss:$8 sps:$4 sm:$0xff]   ;;  %v100_v1 = vld [vmem:[#allocation2 + $0x30] sm:$0xff] }
  0x52   :  { %333 = vmatprep.subr.bf16.mxu0 %v1755_v21  ;;  %416 = vmatprep.subr.bf16.mxu1 %v1757_v22  ;;  %v1800_v61 = vld [vmem:[#allocation8 + $0x130] ss:$8 sps:$4 sm:$0xff]   ;;  %v1808_v63 = vld [vmem:[#allocation8 + $0x124] ss:$8 sps:$4 sm:$0xff]   ;;  %v1803_v3 = vld [vmem:[#allocation8 + $0x20] ss:$8 sps:$4 sm:$0xff]  }
  0x53   :  { %v101_v2 = vld [vmem:[#allocation2 + $0x38] sm:$0xff]  ;;  %v1811_v5 = vld [vmem:[#allocation8 + $0x14] ss:$8 sps:$4 sm:$0xff]   ;;  %v1809_v8 = vld [vmem:[#allocation8 + $0x10] ss:$8 sps:$4 sm:$0xff]  }
  0x54   :  { %v1806_v4 = vld [vmem:[#allocation8 + $0x120] ss:$8 sps:$4 sm:$0xff]   ;;  %v1814_v6 = vld [vmem:[#allocation8 + $0x114] ss:$8 sps:$4 sm:$0xff]   ;;  %v107_v7 = vpack.c.bf16 %v101_v2, %v100_v1  ;;  %v1812_v9 = vld [vmem:[#allocation8 + $0x110] ss:$8 sps:$4 sm:$0xff]  }
  0x55   :  { %334 = vmatpush1.bf16.msra.mxu0 %v1759_v23  ;;  %417 = vmatpush1.bf16.msra.mxu1 %v1760_v24  ;;  %v1817_v10 = vld [vmem:[#allocation8 + $0x4] ss:$8 sps:$4 sm:$0xff]   ;;  %v103_v12 = vld [vmem:[#allocation2 + $0x48] sm:$0xff]  ;;  %v1815_v14 = vld [vmem:[#allocation8] ss:$8 sps:$4 sm:$0xff]  }
  0x56   :  { %335 = vmatprep.subr.bf16.mxu0 %v1761_v25  ;;  %418 = vmatprep.subr.bf16.mxu1 %v1763_v26  ;;  %v102_v11 = vld [vmem:[#allocation2 + $0x40] sm:$0xff]  ;;  %v1818_v15 = vld [vmem:[#allocation8 + $0x100] ss:$8 sps:$4 sm:$0xff]   ;;  %v1823_v16 = vld [vmem:[#allocation8 + $0xf4] ss:$8 sps:$4 sm:$0xff]  }
  0x57   :  { %v1820_v13 = vld [vmem:[#allocation8 + $0x104] ss:$8 sps:$4 sm:$0xff]   ;;  %v1826_v17 = vld [vmem:[#allocation8 + $0x1f4] ss:$8 sps:$4 sm:$0xff]   ;;  %v108_v18 = vpack.c.bf16 %v103_v12, %v102_v11  ;;  %v1821_v19 = vld [vmem:[#allocation8 + $0xf0] ss:$8 sps:$4 sm:$0xff]  }
  0x58   :  { %v1824_v20 = vld [vmem:[#allocation8 + $0x1f0] ss:$8 sps:$4 sm:$0xff]   ;;  %v1829_v21 = vld [vmem:[#allocation8 + $0xe4] ss:$8 sps:$4 sm:$0xff]   ;;  %v1827_v23 = vld [vmem:[#allocation8 + $0xe0] ss:$8 sps:$4 sm:$0xff]  }
  0x59   :  { %336 = vmatpush1.bf16.msra.mxu0 %v1765_v27  ;;  %419 = vmatpush1.bf16.msra.mxu1 %v1766_v28  ;;  %v1832_v22 = vld [vmem:[#allocation8 + $0x1e4] ss:$8 sps:$4 sm:$0xff]   ;;  %v1830_v24 = vld [vmem:[#allocation8 + $0x1e0] ss:$8 sps:$4 sm:$0xff]   ;;  %v1838_v25 = vld [vmem:[#allocation8 + $0x1d4] ss:$8 sps:$4 sm:$0xff]  }
  0x5a   :  { %337 = vmatprep.subr.bf16.mxu0 %v1767_v29  ;;  %420 = vmatprep.subr.bf16.mxu1 %v1769_v30  ;;  %v1833_v26 = vld [vmem:[#allocation8 + $0xd0] ss:$8 sps:$4 sm:$0xff]   ;;  %v1841_v28 = vld [vmem:[#allocation8 + $0xc4] ss:$8 sps:$4 sm:$0xff]   ;;  %v1839_v30 = vld [vmem:[#allocation8 + $0xc0] ss:$8 sps:$4 sm:$0xff]  }
  0x5b   :  { %v1836_v27 = vld [vmem:[#allocation8 + $0x1d0] ss:$8 sps:$4 sm:$0xff]   ;;  %v1844_v29 = vld [vmem:[#allocation8 + $0x1c4] ss:$8 sps:$4 sm:$0xff]   ;;  %v1850_v33 = vld [vmem:[#allocation8 + $0x1b4] ss:$8 sps:$4 sm:$0xff]  }
  0x5c   :  { %v1845_v34 = vld [vmem:[#allocation8 + $0xb0] ss:$8 sps:$4 sm:$0xff]  }
  0x5d   :  { %338 = vmatpush1.bf16.msra.mxu0 %v1771_v31  ;;  %421 = vmatpush1.bf16.msra.mxu1 %v1772_v32  ;;  %v1842_v31 = vld [vmem:[#allocation8 + $0x1c0] ss:$8 sps:$4 sm:$0xff]   ;;  %v1847_v32 = vld [vmem:[#allocation8 + $0xb4] ss:$8 sps:$4 sm:$0xff]   ;;  %v1857_v42 = vld [vmem:[#allocation8 + $0x90] ss:$8 sps:$4 sm:$0xff]  }
  0x5e   :  { %945 = vmatprep.subr.bf16.mxu0 %v1775_v35  ;;  %1028 = vmatprep.subr.bf16.mxu1 %v1778_v36  ;;  %v1848_v35 = vld [vmem:[#allocation8 + $0x1b0] ss:$8 sps:$4 sm:$0xff]   ;;  %v1853_v36 = vld [vmem:[#allocation8 + $0xa4] ss:$8 sps:$4 sm:$0xff]  }
  0x5f   :  { %v1860_v43 = vld [vmem:[#allocation8 + $0x190] ss:$8 sps:$4 sm:$0xff]  }
  0x60   :  { %356 = vmatmul.mubr.bf16.vlgmr.msra.gmra.mxu0 %v104_v37  ;;  %439 = vmatmul.mubr.bf16.vlgmr.msra.gmra.mxu1 %v104_v37  ;;  %v1856_v37 = vld [vmem:[#allocation8 + $0x1a4] ss:$8 sps:$4 sm:$0xff]  }
  0x61   :  { %365 = vmatprep.mubr.bf16.mxu0 %v2064_v0  ;;  %448 = vmatprep.mubr.bf16.mxu1 %v2064_v0 }
  0x62   :  { %946 = vmatpush1.bf16.msra.mxu0 %v1773_v38  ;;  %1029 = vmatpush1.bf16.msra.mxu1 %v1776_v39  ;;  %v1851_v38 = vld [vmem:[#allocation8 + $0xa0] ss:$8 sps:$4 sm:$0xff]  }
  0x63   :  { %947 = vmatprep.subr.bf16.mxu0 %v1781_v40  ;;  %1030 = vmatprep.subr.bf16.mxu1 %v1784_v41  ;;  %v1854_v39 = vld [vmem:[#allocation8 + $0x1a0] ss:$8 sps:$4 sm:$0xff]   ;;  %v1859_v40 = vld [vmem:[#allocation8 + $0x94] ss:$8 sps:$4 sm:$0xff]  }
  0x64   :  { %v1862_v41 = vld [vmem:[#allocation8 + $0x194] ss:$8 sps:$4 sm:$0xff]  }
  0x66   :  { %948 = vmatpush1.bf16.msra.mxu0 %v1779_v44  ;;  %1031 = vmatpush1.bf16.msra.mxu1 %v1782_v45  ;;  %v1865_v44 = vld [vmem:[#allocation8 + $0x84] ss:$8 sps:$4 sm:$0xff]  }
  0x67   :  { %949 = vmatprep.subr.bf16.mxu0 %v1787_v46  ;;  %1032 = vmatprep.subr.bf16.mxu1 %v1790_v47  ;;  %v1868_v45 = vld [vmem:[#allocation8 + $0x184] ss:$8 sps:$4 sm:$0xff]   ;;  %v1863_v46 = vld [vmem:[#allocation8 + $0x80] ss:$8 sps:$4 sm:$0xff]  }
  0x68   :  { %366 = vmatmul.mubr.bf16.gmra.mxu0 %v105_v48  ;;  %449 = vmatmul.mubr.bf16.gmra.mxu1 %v105_v48  ;;  %v1866_v47 = vld [vmem:[#allocation8 + $0x180] ss:$8 sps:$4 sm:$0xff]   ;;  %v1869_v48 = vld [vmem:[#allocation10 + $0x78] sm:$0xff]  }
  0x69   :  { %375 = vmatprep.mubr.bf16.mxu0 %v2064_v0  ;;  %458 = vmatprep.mubr.bf16.mxu1 %v2064_v0 }
  0x6a   :  { %950 = vmatpush1.bf16.msra.mxu0 %v1785_v49  ;;  %1033 = vmatpush1.bf16.msra.mxu1 %v1788_v50  ;;  %v143_v49 = vlaneseq }
  0x6b   :  { %951 = vmatprep.subr.bf16.mxu0 %v1793_v51  ;;  %1034 = vmatprep.subr.bf16.mxu1 %v1796_v52 }
  0x6c   :  { %v2134_v50 = vshrl.u32 %v143_v49, 7 }
  0x6e   :  { %952 = vmatpush1.bf16.msra.mxu0 %v1791_v55  ;;  %1035 = vmatpush1.bf16.msra.mxu1 %v1794_v56  ;;  %v149_v51 = vsub.s32 1, %v2134_v50  ;;  %v157_v52 = vsub.s32 3, %v2134_v50  ;;  %v145_v53 = vsub.s32 0, %v2134_v50  ;;  %v153_v54 = vsub.s32 2, %v2134_v50  ;;  %v141_v55 = vld [vmem:[#allocation7] sm:$0xf] }
  0x6f   :  { %953 = vmatprep.subr.bf16.mxu0 %v1799_v57  ;;  %1036 = vmatprep.subr.bf16.mxu1 %v1802_v58 }
  0x70   :  { %376 = vmatmul.mubr.bf16.gmra.mxu0 %v106_v59  ;;  %459 = vmatmul.mubr.bf16.gmra.mxu1 %v106_v59  ;;  %v2142_v58 = vrot.slane %v141_v55, %v149_v51  ;;  %v2144_v59 = vrot.slane %v141_v55, %v157_v52 }
  0x71   :  { %385 = vmatprep.mubr.bf16.mxu0 %v2064_v0  ;;  %468 = vmatprep.mubr.bf16.mxu1 %v2064_v0 }
  0x72   :  { %954 = vmatpush1.bf16.msra.mxu0 %v1797_v60  ;;  %1037 = vmatpush1.bf16.msra.mxu1 %v1800_v61  ;;  %v2148_v60 = vrot.slane %v141_v55, %v145_v53  ;;  %v2150_v61 = vrot.slane %v141_v55, %v153_v54 }
  0x73   :  { %955 = vmatprep.subr.bf16.mxu0 %v1805_v62  ;;  %1038 = vmatprep.subr.bf16.mxu1 %v1808_v63 }
  0x76   :  { %956 = vmatpush1.bf16.msra.mxu0 %v1803_v3  ;;  %1039 = vmatpush1.bf16.msra.mxu1 %v1806_v4 }
  0x77   :  { %957 = vmatprep.subr.bf16.mxu0 %v1811_v5  ;;  %1040 = vmatprep.subr.bf16.mxu1 %v1814_v6 }
  0x78   :  { %386 = vmatmul.mubr.bf16.gmra.mxu0 %v107_v7  ;;  %469 = vmatmul.mubr.bf16.gmra.mxu1 %v107_v7 }
  0x79   :  { %395 = vmatprep.mubr.bf16.mxu0 %v2064_v0  ;;  %478 = vmatprep.mubr.bf16.mxu1 %v2064_v0  ;;  %v1835_v0 = vld [vmem:[#allocation8 + $0xd4] ss:$8 sps:$4 sm:$0xff]  }
  0x7a   :  { %958 = vmatpush1.bf16.msra.mxu0 %v1809_v8  ;;  %1041 = vmatpush1.bf16.msra.mxu1 %v1812_v9 }
  0x7b   :  { %959 = vmatprep.subr.bf16.mxu0 %v1817_v10  ;;  %1042 = vmatprep.subr.bf16.mxu1 %v1820_v13 }
  0x7e   :  { %960 = vmatpush1.bf16.msra.mxu0 %v1815_v14  ;;  %1043 = vmatpush1.bf16.msra.mxu1 %v1818_v15 }
  0x7f   :  { %961 = vmatprep.subr.bf16.mxu0 %v1823_v16  ;;  %1044 = vmatprep.subr.bf16.mxu1 %v1826_v17 }
  0x80   :  { %396 = vmatmul.mubr.bf16.gmra.mxu0 %v108_v18  ;;  %479 = vmatmul.mubr.bf16.gmra.mxu1 %v108_v18 }
  0x82   :  { %962 = vmatpush2.bf16.msra.mxu0 %v1821_v19  ;;  %1045 = vmatpush2.bf16.msra.mxu1 %v1824_v20 }
  0x83   :  { %963 = vmatprep.subr.bf16.mxu0 %v1829_v21  ;;  %1046 = vmatprep.subr.bf16.mxu1 %v1832_v22 }
  0x86   :  { %964 = vmatpush2.bf16.msra.mxu0 %v1827_v23  ;;  %1047 = vmatpush2.bf16.msra.mxu1 %v1830_v24 }
  0x87   :  { %965 = vmatprep.subr.bf16.mxu0 %v1835_v0  ;;  %1048 = vmatprep.subr.bf16.mxu1 %v1838_v25 }
  0x8a   :  { %966 = vmatpush2.bf16.msra.mxu0 %v1833_v26  ;;  %1049 = vmatpush2.bf16.msra.mxu1 %v1836_v27  ;;  %v1870_v26 = vld [vmem:[#allocation10 + $0x38] sm:$0xff]  }
  0x8b   :  { %967 = vmatprep.subr.bf16.mxu0 %v1841_v28  ;;  %1050 = vmatprep.subr.bf16.mxu1 %v1844_v29 }
  0x8e   :  { %968 = vmatpush2.bf16.msra.mxu0 %v1839_v30  ;;  %1051 = vmatpush2.bf16.msra.mxu1 %v1842_v31 }
  0x8f   :  { %969 = vmatprep.subr.bf16.mxu0 %v1847_v32  ;;  %1052 = vmatprep.subr.bf16.mxu1 %v1850_v33  ;;  %v1871_v32 = vld [vmem:[#allocation10 + $0x70] sm:$0xff]  }
  0x92   :  { %970 = vmatpush2.bf16.msra.mxu0 %v1845_v34  ;;  %1053 = vmatpush2.bf16.msra.mxu1 %v1848_v35 }
  0x93   :  { %971 = vmatprep.subr.bf16.mxu0 %v1853_v36  ;;  %1054 = vmatprep.subr.bf16.mxu1 %v1856_v37 }
  0x96   :  { %972 = vmatpush2.bf16.msra.mxu0 %v1851_v38  ;;  %1055 = vmatpush2.bf16.msra.mxu1 %v1854_v39 }
  0x97   :  { %973 = vmatprep.subr.bf16.mxu0 %v1859_v40  ;;  %1056 = vmatprep.subr.bf16.mxu1 %v1862_v41 }
  0x9a   :  { %974 = vmatpush2.bf16.msra.mxu0 %v1857_v42  ;;  %1057 = vmatpush2.bf16.msra.mxu1 %v1860_v43  ;;  %v1872_v42 = vld [vmem:[#allocation10 + $0x30] sm:$0xff]  }
  0x9b   :  { %975 = vmatprep.subr.bf16.mxu0 %v1865_v44  ;;  %1058 = vmatprep.subr.bf16.mxu1 %v1868_v45 }
  0x9e   :  { %976 = vmatpush2.bf16.msra.mxu0 %v1863_v46  ;;  %1059 = vmatpush2.bf16.msra.mxu1 %v1866_v47  ;;  %v1873_v47 = vld [vmem:[#allocation10 + $0x68] sm:$0xff]  }
  0x9f   :  { %1650 = vmatprep.subr.bf16.mxu0 %v1869_v48  ;;  %1696 = vmatprep.subr.bf16.mxu1 %v1869_v48 }
 0x120   :  { %v357_v56 = vpop.f32.mrf.mxu0  ;;  %v440_v57 = vpop.f32.mrf.mxu1 }
 0x121   :  { %v358_v7 = vadd.f32 %v357_v56, %v2148_v60  ;;  %v441_v8 = vadd.f32 %v440_v57, %v2150_v61 }
 0x122   :  { %v359_v62 = vpop.f32.mrf.mxu0  ;;  %v442_v63 = vpop.f32.mrf.mxu1 }
 0x123   :  { %v360_v3 = vadd.f32 %v359_v62, %v2142_v58  ;;  %v443_v4 = vadd.f32 %v442_v63, %v2144_v59  ;;  %v489_v21 = vmax.f32 %v358_v7, 0.0  ;;  %v491_v22 = vmax.f32 %v441_v8, 0.0  ;;  %v1875_v8 = vld [vmem:[#allocation10 + $0x60] sm:$0xff]  }
 0x124   :  { %v361_v1 = vpop.f32.mrf.mxu0  ;;  %v444_v2 = vpop.f32.mrf.mxu1 }
 0x125   :  { %v362_v5 = vadd.f32 %v361_v1, %v2148_v60  ;;  %v445_v6 = vadd.f32 %v444_v2, %v2150_v61  ;;  %v490_v17 = vmax.f32 %v360_v3, 0.0  ;;  %v492_v18 = vmax.f32 %v443_v4, 0.0  ;;  %v1874_v2 = vld [vmem:[#allocation10 + $0x28] sm:$0xff]  }
 0x126   :  { %v363_v9 = vpop.f32.mrf.mxu0  ;;  %v446_v10 = vpop.f32.mrf.mxu1 }
 0x127   :  { %v364_v11 = vadd.f32 %v363_v9, %v2142_v58  ;;  %v447_v12 = vadd.f32 %v446_v10, %v2144_v59  ;;  %v493_v13 = vmax.f32 %v362_v5, 0.0  ;;  %v495_v14 = vmax.f32 %v445_v6, 0.0 }
 0x128   :  { %v367_v15 = vpop.f32.mrf.mxu0  ;;  %v450_v16 = vpop.f32.mrf.mxu1 }
 0x129   :  { %v494_v19 = vmax.f32 %v364_v11, 0.0  ;;  %v496_v20 = vmax.f32 %v447_v12, 0.0  ;;  %v529_v27 = vpack.c.bf16 %v493_v13, %v489_v21  ;;  %v531_v28 = vpack.c.bf16 %v495_v14, %v491_v22 }
 0x12a   :  { %v369_v23 = vpop.f32.mrf.mxu0  ;;  %v452_v24 = vpop.f32.mrf.mxu1  ;;  %v368_v36 = vadd.f32 %v367_v15, %v2148_v60  ;;  %v451_v37 = vadd.f32 %v450_v16, %v2150_v61 }
 0x12b   :  { %v530_v0 = vpack.c.bf16 %v494_v19, %v490_v17  ;;  %v532_v25 = vpack.c.bf16 %v496_v20, %v492_v18  ;;  %v370_v29 = vadd.f32 %v369_v23, %v2142_v58  ;;  %v453_v33 = vadd.f32 %v452_v24, %v2144_v59  ;;  %v1876_v18 = vld [vmem:[#allocation10 + $0x20] sm:$0xff]  }
 0x12c   :  { %v371_v30 = vpop.f32.mrf.mxu0  ;;  %v454_v31 = vpop.f32.mrf.mxu1  ;;  %v497_v55 = vmax.f32 %v368_v36, 0.0  ;;  %v499_v56 = vmax.f32 %v451_v37, 0.0 }
 0x12d   :  { %v372_v34 = vadd.f32 %v371_v30, %v2148_v60  ;;  %v455_v35 = vadd.f32 %v454_v31, %v2150_v61  ;;  %977 = vmatprep.mubr.bf16.mxu0 %v530_v0  ;;  %1060 = vmatprep.mubr.bf16.mxu1 %v532_v25  ;;  %v498_v48 = vmax.f32 %v370_v29, 0.0  ;;  %v500_v49 = vmax.f32 %v453_v33, 0.0 }
 0x12e   :  { %v373_v38 = vpop.f32.mrf.mxu0  ;;  %v456_v39 = vpop.f32.mrf.mxu1  ;;  %978 = vmatmul.mubr.bf16.vlgmr.msra.gmra.mxu0 %v529_v27  ;;  %1061 = vmatmul.mubr.bf16.vlgmr.msra.gmra.mxu1 %v531_v28 }
 0x12f   :  { %v374_v40 = vadd.f32 %v373_v38, %v2142_v58  ;;  %v457_v41 = vadd.f32 %v456_v39, %v2144_v59  ;;  %1651 = vmatpush3.bf16.msra.mxu0 %v1870_v26  ;;  %1704 = vmatpush3.bf16.msra.mxu1 %v1870_v26  ;;  %v501_v43 = vmax.f32 %v372_v34, 0.0  ;;  %v503_v44 = vmax.f32 %v455_v35, 0.0 }
 0x130   :  { %v377_v45 = vpop.f32.mrf.mxu0  ;;  %v460_v46 = vpop.f32.mrf.mxu1  ;;  %1652 = vmatprep.subr.bf16.mxu0 %v1871_v32  ;;  %1697 = vmatprep.subr.bf16.mxu1 %v1871_v32 }
 0x131   :  { %v502_v52 = vmax.f32 %v374_v40, 0.0  ;;  %v504_v54 = vmax.f32 %v457_v41, 0.0  ;;  %v533_v3 = vpack.c.bf16 %v501_v43, %v497_v55  ;;  %v535_v4 = vpack.c.bf16 %v503_v44, %v499_v56 }
 0x132   :  { %v379_v57 = vpop.f32.mrf.mxu0  ;;  %v462_v62 = vpop.f32.mrf.mxu1  ;;  %v378_v12 = vadd.f32 %v377_v45, %v2148_v60  ;;  %v461_v13 = vadd.f32 %v460_v46, %v2150_v61 }
 0x133   :  { %v534_v63 = vpack.c.bf16 %v502_v52, %v498_v48  ;;  %v536_v1 = vpack.c.bf16 %v504_v54, %v500_v49  ;;  %1653 = vmatpush3.bf16.msra.mxu0 %v1872_v42  ;;  %v380_v5 = vadd.f32 %v379_v57, %v2142_v58  ;;  %1705 = vmatpush3.bf16.msra.mxu1 %v1872_v42 }
 0x134   :  { %v381_v6 = vpop.f32.mrf.mxu0  ;;  %v464_v7 = vpop.f32.mrf.mxu1  ;;  %1654 = vmatprep.subr.bf16.mxu0 %v1873_v47  ;;  %v463_v9 = vadd.f32 %v462_v62, %v2144_v59  ;;  %1698 = vmatprep.subr.bf16.mxu1 %v1873_v47  ;;  %v505_v26 = vmax.f32 %v378_v12, 0.0  ;;  %v507_v27 = vmax.f32 %v461_v13, 0.0 }
 0x135   :  { %v382_v10 = vadd.f32 %v381_v6, %v2148_v60  ;;  %v465_v11 = vadd.f32 %v464_v7, %v2150_v61  ;;  %987 = vmatprep.mubr.bf16.mxu0 %v534_v63  ;;  %1070 = vmatprep.mubr.bf16.mxu1 %v536_v1  ;;  %v506_v23 = vmax.f32 %v380_v5, 0.0 }
 0x136   :  { %v383_v14 = vpop.f32.mrf.mxu0  ;;  %v466_v15 = vpop.f32.mrf.mxu1  ;;  %988 = vmatmul.mubr.bf16.gmra.mxu0 %v533_v3  ;;  %1071 = vmatmul.mubr.bf16.gmra.mxu1 %v535_v4  ;;  %v508_v24 = vmax.f32 %v463_v9, 0.0 }
 0x137   :  { %v384_v16 = vadd.f32 %v383_v14, %v2142_v58  ;;  %v467_v17 = vadd.f32 %v466_v15, %v2144_v59  ;;  %1655 = vmatpush3.bf16.msra.mxu0 %v1874_v2  ;;  %v509_v19 = vmax.f32 %v382_v10, 0.0  ;;  %v511_v20 = vmax.f32 %v465_v11, 0.0  ;;  %1706 = vmatpush3.bf16.msra.mxu1 %v1874_v2 }
 0x138   :  { %v387_v21 = vpop.f32.mrf.mxu0  ;;  %v470_v22 = vpop.f32.mrf.mxu1  ;;  %1656 = vmatprep.subr.bf16.mxu0 %v1875_v8  ;;  %1699 = vmatprep.subr.bf16.mxu1 %v1875_v8 }
 0x139   :  { %v510_v0 = vmax.f32 %v384_v16, 0.0  ;;  %v512_v25 = vmax.f32 %v467_v17, 0.0  ;;  %v537_v32 = vpack.c.bf16 %v509_v19, %v505_v26  ;;  %v539_v33 = vpack.c.bf16 %v511_v20, %v507_v27  ;;  %v1877_v27 = vld [vmem:[#allocation10 + $0x58] sm:$0xff]  }
 0x13a   :  { %v389_v28 = vpop.f32.mrf.mxu0  ;;  %v472_v29 = vpop.f32.mrf.mxu1  ;;  %v388_v40 = vadd.f32 %v387_v21, %v2148_v60  ;;  %v471_v41 = vadd.f32 %v470_v22, %v2150_v61 }
 0x13b   :  { %v538_v30 = vpack.c.bf16 %v510_v0, %v506_v23  ;;  %v540_v31 = vpack.c.bf16 %v512_v25, %v508_v24  ;;  %1657 = vmatpush3.bf16.msra.mxu0 %v1876_v18  ;;  %v390_v34 = vadd.f32 %v389_v28, %v2142_v58  ;;  %1707 = vmatpush3.bf16.msra.mxu1 %v1876_v18  ;;  %v1880_v28 = vld [vmem:[#allocation10 + $0x10] sm:$0xff]  }
 0x13c   :  { %v391_v35 = vpop.f32.mrf.mxu0  ;;  %v474_v36 = vpop.f32.mrf.mxu1  ;;  %v473_v37 = vadd.f32 %v472_v29, %v2144_v59  ;;  %v513_v57 = vmax.f32 %v388_v40, 0.0  ;;  %v515_v62 = vmax.f32 %v471_v41, 0.0  ;;  %1658 = vmatprep.subr.bf16.mxu0 %v1877_v27  ;;  %1700 = vmatprep.subr.bf16.mxu1 %v1877_v27  ;;  %v1881_v29 = vld [vmem:[#allocation10 + $0x48] sm:$0xff]  }
 0x13d   :  { %v392_v38 = vadd.f32 %v391_v35, %v2148_v60  ;;  %v475_v39 = vadd.f32 %v474_v36, %v2150_v61  ;;  %997 = vmatprep.mubr.bf16.mxu0 %v538_v30  ;;  %1080 = vmatprep.mubr.bf16.mxu1 %v540_v31  ;;  %v514_v52 = vmax.f32 %v390_v34, 0.0  ;;  %v1882_v30 = vld [vmem:[#allocation10 + $0x8] sm:$0xff]   ;;  %v1883_v31 = vld [vmem:[#allocation10 + $0x40] sm:$0xff]  }
 0x13e   :  { %v393_v42 = vpop.f32.mrf.mxu0  ;;  %v476_v43 = vpop.f32.mrf.mxu1  ;;  %998 = vmatmul.mubr.bf16.gmra.mxu0 %v537_v32  ;;  %1081 = vmatmul.mubr.bf16.gmra.mxu1 %v539_v33  ;;  %v516_v54 = vmax.f32 %v473_v37, 0.0  ;;  %v1884_v32 = vld [vmem:[#allocation10] sm:$0xff]   ;;  %v613_v33 = vld [vmem:[%s2248_s4] sm:$0x3] }
 0x13f   :  { %v394_v44 = vadd.f32 %v393_v42, %v2142_v58  ;;  %v477_v45 = vadd.f32 %v476_v43, %v2144_v59  ;;  %v517_v46 = vmax.f32 %v392_v38, 0.0  ;;  %v519_v47 = vmax.f32 %v475_v39, 0.0 }
 0x140   :  { %v397_v48 = vpop.f32.mrf.mxu0  ;;  %v480_v49 = vpop.f32.mrf.mxu1  ;;  %v2197_v34 = vrot.slane %v613_v33, %v149_v51  ;;  %v2201_v35 = vrot.slane %v613_v33, %v145_v53 }
 0x141   :  { %v518_v55 = vmax.f32 %v394_v44, 0.0  ;;  %v520_v56 = vmax.f32 %v477_v45, 0.0  ;;  %v541_v4 = vpack.c.bf16 %v517_v46, %v513_v57  ;;  %v543_v5 = vpack.c.bf16 %v519_v47, %v515_v62 }
 0x142   :  { %v399_v63 = vpop.f32.mrf.mxu0  ;;  %v482_v1 = vpop.f32.mrf.mxu1  ;;  %v398_v12 = vadd.f32 %v397_v48, %v2148_v60  ;;  %v481_v13 = vadd.f32 %v480_v49, %v2150_v61 }
 0x143   :  { %v542_v2 = vpack.c.bf16 %v518_v55, %v514_v52  ;;  %v544_v3 = vpack.c.bf16 %v520_v56, %v516_v54  ;;  %v400_v6 = vadd.f32 %v399_v63, %v2142_v58  ;;  %v483_v9 = vadd.f32 %v482_v1, %v2144_v59 }
 0x144   :  { %v401_v7 = vpop.f32.mrf.mxu0  ;;  %v484_v8 = vpop.f32.mrf.mxu1  ;;  %v521_v24 = vmax.f32 %v398_v12, 0.0  ;;  %v523_v0 = vmax.f32 %v481_v13, 0.0 }
 0x145   :  { %v402_v10 = vadd.f32 %v401_v7, %v2148_v60  ;;  %v485_v11 = vadd.f32 %v484_v8, %v2150_v61  ;;  %1007 = vmatprep.mubr.bf16.mxu0 %v542_v2  ;;  %1090 = vmatprep.mubr.bf16.mxu1 %v544_v3  ;;  %v522_v20 = vmax.f32 %v400_v6, 0.0  ;;  %v524_v21 = vmax.f32 %v483_v9, 0.0 }
 0x146   :  { %v403_v14 = vpop.f32.mrf.mxu0  ;;  %v486_v15 = vpop.f32.mrf.mxu1  ;;  %1008 = vmatmul.mubr.bf16.gmra.mxu0 %v541_v4  ;;  %1091 = vmatmul.mubr.bf16.gmra.mxu1 %v543_v5 }
 0x147   :  { %v404_v16 = vadd.f32 %v403_v14, %v2142_v58  ;;  %v487_v17 = vadd.f32 %v486_v15, %v2144_v59  ;;  %v525_v18 = vmax.f32 %v402_v10, 0.0  ;;  %v527_v19 = vmax.f32 %v485_v11, 0.0  ;;  %v1878_v58 = vld [vmem:[#allocation10 + $0x18] sm:$0xff]   ;;  %v1879_v59 = vld [vmem:[#allocation10 + $0x50] sm:$0xff]  }
 0x148   :  { %1659 = vmatpush3.bf16.msra.mxu0 %v1878_v58  ;;  %1708 = vmatpush3.bf16.msra.mxu1 %v1878_v58 }
 0x149   :  { %v526_v22 = vmax.f32 %v404_v16, 0.0  ;;  %v528_v23 = vmax.f32 %v487_v17, 0.0  ;;  %v545_v26 = vpack.c.bf16 %v525_v18, %v521_v24  ;;  %v547_v61 = vpack.c.bf16 %v527_v19, %v523_v0  ;;  %1660 = vmatprep.subr.bf16.mxu0 %v1879_v59  ;;  %1701 = vmatprep.subr.bf16.mxu1 %v1879_v59 }
 0x14b   :  { %v546_v25 = vpack.c.bf16 %v526_v22, %v522_v20  ;;  %v548_v60 = vpack.c.bf16 %v528_v23, %v524_v21 }
 0x14c   :  { %1661 = vmatpush3.bf16.msra.mxu0 %v1880_v28  ;;  %1709 = vmatpush3.bf16.msra.mxu1 %v1880_v28 }
 0x14d   :  { %1017 = vmatprep.mubr.bf16.mxu0 %v546_v25  ;;  %1100 = vmatprep.mubr.bf16.mxu1 %v548_v60 }
 0x14e   :  { %1018 = vmatmul.mubr.bf16.gmra.mxu0 %v545_v26  ;;  %1101 = vmatmul.mubr.bf16.gmra.mxu1 %v547_v61 }
 0x14f   :  { %1662 = vmatprep.subr.bf16.mxu0 %v1881_v29  ;;  %1702 = vmatprep.subr.bf16.mxu1 %v1881_v29 }
 0x150   :  { %1663 = vmatpush3.bf16.msra.mxu0 %v1882_v30  ;;  %1710 = vmatpush3.bf16.msra.mxu1 %v1882_v30 }
 0x151   :  { %1664 = vmatprep.subr.bf16.mxu0 %v1883_v31  ;;  %1703 = vmatprep.subr.bf16.mxu1 %v1883_v31 }
 0x154   :  { %1665 = vmatpush3.bf16.msra.mxu0 %v1884_v32  ;;  %1711 = vmatpush3.bf16.msra.mxu1 %v1884_v32 }
 0x1ee   :  { %v979_v36 = vpop.f32.mrf.mxu0  ;;  %v1062_v37 = vpop.f32.mrf.mxu1 }
 0x1ef   :  { %v980_v41 = vadd.f32 %v979_v36, %v2201_v35 }
 0x1f0   :  { %v981_v38 = vpop.f32.mrf.mxu0  ;;  %v1064_v39 = vpop.f32.mrf.mxu1 }
 0x1f1   :  { %v982_v40 = vadd.f32 %v981_v38, %v2197_v34  ;;  %v1063_v53 = vadd.f32 %v1062_v37, %v980_v41 }
 0x1f2   :  { %v983_v42 = vpop.f32.mrf.mxu0  ;;  %v1066_v43 = vpop.f32.mrf.mxu1 }
 0x1f3   :  { %v984_v44 = vadd.f32 %v983_v42, %v2201_v35  ;;  %v1065_v51 = vadd.f32 %v1064_v39, %v982_v40  ;;  %v1111_v1 = vmax.f32 %v1063_v53, 0.0 }
 0x1f4   :  { %v985_v45 = vpop.f32.mrf.mxu0  ;;  %v1068_v46 = vpop.f32.mrf.mxu1 }
 0x1f5   :  { %v1067_v47 = vadd.f32 %v1066_v43, %v984_v44  ;;  %v986_v50 = vadd.f32 %v985_v45, %v2197_v34  ;;  %v1112_v57 = vmax.f32 %v1065_v51, 0.0 }
 0x1f6   :  { %v989_v48 = vpop.f32.mrf.mxu0  ;;  %v1072_v49 = vpop.f32.mrf.mxu1 }
 0x1f7   :  { %v1069_v52 = vadd.f32 %v1068_v46, %v986_v50  ;;  %v1113_v54 = vmax.f32 %v1067_v47, 0.0  ;;  %v990_v2 = vadd.f32 %v989_v48, %v2201_v35 }
 0x1f8   :  { %v991_v55 = vpop.f32.mrf.mxu0  ;;  %v1074_v56 = vpop.f32.mrf.mxu1 }
 0x1f9   :  { %v1114_v62 = vmax.f32 %v1069_v52, 0.0  ;;  %v992_v63 = vadd.f32 %v991_v55, %v2197_v34  ;;  %v1131_v7 = vpack.c.bf16 %v1113_v54, %v1111_v1  ;;  %v1073_v13 = vadd.f32 %v1072_v49, %v990_v2 }
 0x1fa   :  { %v993_v3 = vpop.f32.mrf.mxu0  ;;  %v1076_v4 = vpop.f32.mrf.mxu1 }
 0x1fb   :  { %v1132_v5 = vpack.c.bf16 %v1114_v62, %v1112_v57  ;;  %v994_v6 = vadd.f32 %v993_v3, %v2201_v35  ;;  %v1075_v10 = vadd.f32 %v1074_v56, %v992_v63  ;;  %v1115_v23 = vmax.f32 %v1073_v13, 0.0 }
 0x1fc   :  { %v995_v8 = vpop.f32.mrf.mxu0  ;;  %v1078_v9 = vpop.f32.mrf.mxu1 }
 0x1fd   :  { %v1077_v11 = vadd.f32 %v1076_v4, %v994_v6  ;;  %v996_v12 = vadd.f32 %v995_v8, %v2197_v34  ;;  %1308 = vmatprep.mubr.bf16.mxu0 %v1132_v5  ;;  %v1116_v20 = vmax.f32 %v1075_v10, 0.0 }
 0x1fe   :  { %v999_v14 = vpop.f32.mrf.mxu0  ;;  %v1082_v15 = vpop.f32.mrf.mxu1  ;;  %1309 = vmatmul.mubr.bf16.vlgmr.msra.gmra.mxu0 %v1131_v7 }
 0x1ff   :  { %v1079_v16 = vadd.f32 %v1078_v9, %v996_v12  ;;  %v1117_v17 = vmax.f32 %v1077_v11, 0.0  ;;  %v1000_v24 = vadd.f32 %v999_v14, %v2201_v35 }
 0x200   :  { %v1001_v18 = vpop.f32.mrf.mxu0  ;;  %v1084_v19 = vpop.f32.mrf.mxu1 }
 0x201   :  { %v1118_v21 = vmax.f32 %v1079_v16, 0.0  ;;  %v1002_v22 = vadd.f32 %v1001_v18, %v2197_v34  ;;  %v1133_v61 = vpack.c.bf16 %v1117_v17, %v1115_v23  ;;  %v1083_v30 = vadd.f32 %v1082_v15, %v1000_v24 }
 0x202   :  { %v1003_v0 = vpop.f32.mrf.mxu0  ;;  %v1086_v25 = vpop.f32.mrf.mxu1 }
 0x203   :  { %v1134_v60 = vpack.c.bf16 %v1118_v21, %v1116_v20  ;;  %v1004_v26 = vadd.f32 %v1003_v0, %v2201_v35  ;;  %v1085_v59 = vadd.f32 %v1084_v19, %v1002_v22  ;;  %v1119_v42 = vmax.f32 %v1083_v30, 0.0  ;;  %v2226_v0 = vld [vmem:[%s2250_s6] ss:$0 sm:$0xff]  ;;  %s2065_s6 = smov [#allocation11]  }
 0x204   :  { %v1005_v27 = vpop.f32.mrf.mxu0  ;;  %v1088_v58 = vpop.f32.mrf.mxu1  ;;  %s1464_s30 = sshll.u32 %s2065_s6, 4  ;;  %s1465_s30 = int_to_ptr.vmem [resolvable:$true] %s1464_s30 }
 0x205   :  { %v1087_v28 = vadd.f32 %v1086_v25, %v1004_v26  ;;  %v1006_v29 = vadd.f32 %v1005_v27, %v2197_v34  ;;  %1316 = vmatprep.mubr.bf16.mxu0 %v1134_v60  ;;  %v1120_v39 = vmax.f32 %v1085_v59, 0.0  ;;  %s2025_s8 = scalar_lea.vmem %s1465_s30, 640  ;;  %p2030_p12 = scmp.lt.s32.totalorder %s1465_s30, %s1465_s30 }
 0x206   :  { %v1009_v31 = vpop.f32.mrf.mxu0  ;;  %v1092_v32 = vpop.f32.mrf.mxu1  ;;  %1317 = vmatmul.mubr.bf16.gmra.mxu0 %v1133_v61  ;;  %p2026_p11 = scmp.ne.s32.totalorder %s1465_s30, %s2025_s8  ;;  %p2031_p13 = scmp.lt.s32.totalorder %s2025_s8, %s2025_s8 }
 0x207   :  { %v1089_v33 = vadd.f32 %v1088_v58, %v1006_v29  ;;  %v1121_v36 = vmax.f32 %v1087_v28, 0.0  ;;  %v1010_v43 = vadd.f32 %v1009_v31, %v2201_v35 }
 0x208   :  { %v1011_v37 = vpop.f32.mrf.mxu0  ;;  %v1094_v38 = vpop.f32.mrf.mxu1  ;;  %p2032_p0 = por %p2031_p13, %p2030_p12 }
 0x209   :  { %v1122_v40 = vmax.f32 %v1089_v33, 0.0  ;;  %v1012_v41 = vadd.f32 %v1011_v37, %v2197_v34  ;;  %v1135_v47 = vpack.c.bf16 %v1121_v36, %v1119_v42  ;;  %v1093_v54 = vadd.f32 %v1092_v32, %v1010_v43 }
 0x20a   :  { %v1013_v44 = vpop.f32.mrf.mxu0  ;;  %v1096_v45 = vpop.f32.mrf.mxu1  ;;  %p2033_p1 = pnand %p2032_p0, %p2026_p11 }
 0x20b   :  { %v1136_v46 = vpack.c.bf16 %v1122_v40, %v1120_v39  ;;  %v1014_v51 = vadd.f32 %v1013_v44, %v2201_v35  ;;  %v1095_v48 = vadd.f32 %v1094_v38, %v1012_v41  ;;  %v1123_v5 = vmax.f32 %v1093_v54, 0.0 }
 0x20c   :  { %v1015_v50 = vpop.f32.mrf.mxu0  ;;  %v1098_v53 = vpop.f32.mrf.mxu1 }
 0x20d   :  { %v1097_v49 = vadd.f32 %v1096_v45, %v1014_v51  ;;  %v1016_v52 = vadd.f32 %v1015_v50, %v2197_v34  ;;  %1324 = vmatprep.mubr.bf16.mxu0 %v1136_v46  ;;  %v1124_v2 = vmax.f32 %v1095_v48, 0.0 }
 0x20e   :  { %v1019_v55 = vpop.f32.mrf.mxu0  ;;  %v1102_v56 = vpop.f32.mrf.mxu1  ;;  %1325 = vmatmul.mubr.bf16.gmra.mxu0 %v1135_v47 }
 0x20f   :  { %v1099_v57 = vadd.f32 %v1098_v53, %v1016_v52  ;;  %v1125_v62 = vmax.f32 %v1097_v49, 0.0  ;;  %v1020_v6 = vadd.f32 %v1019_v55, %v2201_v35 }
 0x210   :  { %v1021_v63 = vpop.f32.mrf.mxu0  ;;  %v1104_v1 = vpop.f32.mrf.mxu1 }
 0x211   :  { %v1126_v3 = vmax.f32 %v1099_v57, 0.0  ;;  %v1022_v4 = vadd.f32 %v1021_v63, %v2197_v34  ;;  %v1137_v11 = vpack.c.bf16 %v1125_v62, %v1123_v5  ;;  %v1103_v16 = vadd.f32 %v1102_v56, %v1020_v6 }
 0x212   :  { %v1023_v7 = vpop.f32.mrf.mxu0  ;;  %v1106_v8 = vpop.f32.mrf.mxu1 }
 0x213   :  { %v1138_v9 = vpack.c.bf16 %v1126_v3, %v1124_v2  ;;  %v1024_v10 = vadd.f32 %v1023_v7, %v2201_v35  ;;  %v1105_v13 = vadd.f32 %v1104_v1, %v1022_v4  ;;  %v1127_v22 = vmax.f32 %v1103_v16, 0.0 }
 0x214   :  { %v1025_v12 = vpop.f32.mrf.mxu0  ;;  %v1108_v17 = vpop.f32.mrf.mxu1 }
 0x215   :  { %v1107_v14 = vadd.f32 %v1106_v8, %v1024_v10  ;;  %v1026_v15 = vadd.f32 %v1025_v12, %v2197_v34  ;;  %1332 = vmatprep.mubr.bf16.mxu1 %v1138_v9  ;;  %v1128_v20 = vmax.f32 %v1105_v13, 0.0 }
 0x216   :  { %1333 = vmatmul.mubr.bf16.vlgmr.msra.gmra.mxu1 %v1137_v11 }
 0x217   :  { %v1109_v18 = vadd.f32 %v1108_v17, %v1026_v15  ;;  %v1129_v19 = vmax.f32 %v1107_v14, 0.0 }
 0x219   :  { %v1130_v21 = vmax.f32 %v1109_v18, 0.0  ;;  %v1139_v24 = vpack.c.bf16 %v1129_v19, %v1127_v22 }
 0x21b   :  { %v1140_v23 = vpack.c.bf16 %v1130_v21, %v1128_v20 }
 0x21d   :  { %1340 = vmatprep.mubr.bf16.mxu1 %v1140_v23 }
 0x21e   :  { %1341 = vmatmul.mubr.bf16.gmra.mxu1 %v1139_v24 }
 0x2be   :  { %v1666_v35 = vpop.f32.mrf.mxu0 }
 0x2c0   :  { %v1667_v34 = vpop.f32.mrf.mxu0 }
 0x2c1   :  { %v1668_v25 = vadd.f32 %v1667_v34, %v1666_v35 }
 0x2c2   :  { %v1669_v60 = vpop.f32.mrf.mxu0 }
 0x2c3   :  { %v1311_v26 = vadd.f32 %v1668_v25, %v2226_v0 }
 0x2c4   :  { %v1670_v61 = vpop.f32.mrf.mxu0 }
 0x2c5   :  { %v1591_v27 = vmul.f32 -1.442695, %v1311_v26  ;;  %v1671_v58 = vadd.f32 %v1670_v61, %v1669_v60 }
 0x2c6   :  { %v1672_v59 = vpop.f32.mrf.mxu0 }
 0x2c7   :  { %1885 = vpow2.f32 %v1591_v27  ;;  %v1314_v28 = vadd.f32 %v1671_v58, %v2226_v0 }
 0x2c8   :  { %v1673_v29 = vpop.f32.mrf.mxu0 }
 0x2c9   :  { %v1592_v30 = vmul.f32 -1.442695, %v1314_v28  ;;  %v1674_v31 = vadd.f32 %v1673_v29, %v1672_v59 }
 0x2ca   :  { %v1675_v32 = vpop.f32.mrf.mxu0 }
 0x2cb   :  { %1887 = vpow2.f32 %v1592_v30  ;;  %v1319_v33 = vadd.f32 %v1674_v31, %v2226_v0 }
 0x2cc   :  { %v1676_v36 = vpop.f32.mrf.mxu0 }
 0x2cd   :  { %v1593_v37 = vmul.f32 -1.442695, %v1319_v33  ;;  %v1677_v38 = vadd.f32 %v1676_v36, %v1675_v32 }
 0x2ce   :  { %v1678_v39 = vpop.f32.mrf.mxu0 }
 0x2cf   :  { %1889 = vpow2.f32 %v1593_v37  ;;  %v1322_v40 = vadd.f32 %v1677_v38, %v2226_v0 }
 0x2d0   :  { %v1679_v41 = vpop.f32.mrf.mxu0 }
 0x2d1   :  { %v1594_v42 = vmul.f32 -1.442695, %v1322_v40  ;;  %v1680_v43 = vadd.f32 %v1679_v41, %v1678_v39 }
 0x2d2   :  { %v1681_v44 = vpop.f32.mrf.mxu0 }
 0x2d3   :  { %1891 = vpow2.f32 %v1594_v42  ;;  %v1327_v45 = vadd.f32 %v1680_v43, %v2226_v0 }
 0x2d4   :  { %v1886_v46 = vpop.eup %1885  ;;  %v1682_v51 = vpop.f32.mrf.mxu0 }
 0x2d5   :  { %v1595_v47 = vmul.f32 -1.442695, %v1327_v45  ;;  %v1683_v50 = vadd.f32 %v1682_v51, %v1681_v44  ;;  %v1379_v53 = vadd.f32 1.0, %v1886_v46 }
 0x2d6   :  { %v1684_v48 = vpop.f32.mrf.mxu1 }
 0x2d7   :  { %v1330_v49 = vadd.f32 %v1683_v50, %v2226_v0  ;;  %1893 = vpow2.f32 %v1595_v47 }
 0x2d8   :  { %v1888_v52 = vpop.eup %1887  ;;  %v1685_v54 = vpop.f32.mrf.mxu1  ;;  %1895 = vrcp.f32 %v1379_v53 }
 0x2d9   :  { %v1380_v55 = vadd.f32 1.0, %v1888_v52  ;;  %v1596_v56 = vmul.f32 -1.442695, %v1330_v49  ;;  %v1686_v57 = vadd.f32 %v1685_v54, %v1684_v48 }
 0x2da   :  { %v1687_v62 = vpop.f32.mrf.mxu1 }
 0x2db   :  { %1897 = vrcp.f32 %v1380_v55  ;;  %v1335_v63 = vadd.f32 %v1686_v57, %v2226_v0 }
 0x2dc   :  { %v1890_v1 = vpop.eup %1889  ;;  %1899 = vpow2.f32 %v1596_v56  ;;  %v1688_v2 = vpop.f32.mrf.mxu1 }
 0x2dd   :  { %v1597_v3 = vmul.f32 -1.442695, %v1335_v63  ;;  %v1689_v4 = vadd.f32 %v1688_v2, %v1687_v62  ;;  %v1381_v5 = vadd.f32 1.0, %v1890_v1 }
 0x2de   :  { %v1690_v6 = vpop.f32.mrf.mxu1 }
 0x2df   :  { %v1338_v7 = vadd.f32 %v1689_v4, %v2226_v0  ;;  %1901 = vpow2.f32 %v1597_v3 }
 0x2e0   :  { %v1892_v8 = vpop.eup %1891  ;;  %v1691_v9 = vpop.f32.mrf.mxu1  ;;  %1903 = vrcp.f32 %v1381_v5 }
 0x2e1   :  { %v1382_v10 = vadd.f32 1.0, %v1892_v8  ;;  %v1598_v11 = vmul.f32 -1.442695, %v1338_v7  ;;  %v1692_v12 = vadd.f32 %v1691_v9, %v1690_v6 }
 0x2e2   :  { %v1693_v13 = vpop.f32.mrf.mxu1 }
 0x2e3   :  { %1905 = vrcp.f32 %v1382_v10  ;;  %v1343_v14 = vadd.f32 %v1692_v12, %v2226_v0 }
 0x2e4   :  { %1907 = vpow2.f32 %v1598_v11  ;;  %v1694_v15 = vpop.f32.mrf.mxu1  ;;  %v1894_v16 = vpop.eup %1893 }
 0x2e5   :  { %v1599_v17 = vmul.f32 -1.442695, %v1343_v14  ;;  %v1695_v18 = vadd.f32 %v1694_v15, %v1693_v13  ;;  %v1383_v19 = vadd.f32 1.0, %v1894_v16  ;;  %v1896_v20 = vpop.eup %1895 }
 0x2e7   :  { %1909 = vpow2.f32 %v1599_v17  ;;  %v1346_v21 = vadd.f32 %v1695_v18, %v2226_v0 }
 0x2e8   :  { %v1898_v22 = vpop.eup %1897  ;;  %1911 = vrcp.f32 %v1383_v19 }
 0x2e9   :  { %v1900_v23 = vpop.eup %1899  ;;  %v1600_v24 = vmul.f32 -1.442695, %v1346_v21  ;;  %v1624_v35 = vpack.c.bf16 %v1898_v22, %v1896_v20 }
 0x2ea   :  { %v1384_v34 = vadd.f32 1.0, %v1900_v23 }
 0x2eb   :  { %1913 = vpow2.f32 %v1600_v24  ;;  %1625 = vst [vmem:[#allocation11] sm:$0xff] %v1624_v35  }
 0x2ec   :  { %1915 = vrcp.f32 %v1384_v34  ;;  %v1902_v25 = vpop.eup %1901 }
 0x2ed   :  { %v1904_v60 = vpop.eup %1903  ;;  %v1385_v26 = vadd.f32 1.0, %v1902_v25 }
 0x2ef   :  { %1917 = vrcp.f32 %v1385_v26 }
 0x2f0   :  { %v1906_v61 = vpop.eup %1905 }
 0x2f1   :  { %v1908_v27 = vpop.eup %1907  ;;  %v1629_v58 = vpack.c.bf16 %v1906_v61, %v1904_v60 }
 0x2f2   :  { %v1386_v59 = vadd.f32 1.0, %v1908_v27 }
 0x2f3   :  { %1646 = vst [vmem:[#allocation11 + $0x8] sm:$0xff] %v1629_v58  }
 0x2f4   :  { %v1910_v28 = vpop.eup %1909  ;;  %1919 = vrcp.f32 %v1386_v59 }
 0x2f5   :  { %v1387_v0 = vadd.f32 1.0, %v1910_v28  ;;  %v1912_v29 = vpop.eup %1911 }
 0x2f7   :  { %1921 = vrcp.f32 %v1387_v0 }
 0x2f8   :  { %v1914_v30 = vpop.eup %1913 }
 0x2f9   :  { %v1916_v31 = vpop.eup %1915  ;;  %v1388_v32 = vadd.f32 1.0, %v1914_v30 }
 0x2fa   :  { %v1634_v33 = vpack.c.bf16 %v1916_v31, %v1912_v29 }
 0x2fb   :  { %1923 = vrcp.f32 %v1388_v32 }
 0x2fc   :  { %1647 = vst [vmem:[#allocation11 + $0x10] sm:$0xff] %v1634_v33   ;;  %v1918_v36 = vpop.eup %1917 }
 0x301   :  { %v1920_v37 = vpop.eup %1919 }
 0x302   :  { %v1639_v38 = vpack.c.bf16 %v1920_v37, %v1918_v36 }
 0x304   :  { %1648 = vst [vmem:[#allocation11 + $0x18] sm:$0xff] %v1639_v38   ;;  %v1922_v39 = vpop.eup %1921 }
 0x308   :  { %v1924_v40 = vpop.eup %1923 }
 0x309   :  { %v1644_v41 = vpack.c.bf16 %v1924_v40, %v1922_v39 }
 0x30b   :  { %1649 = vst [vmem:[#allocation11 + $0x20] sm:$0xff] %v1644_v41  }
 0x30c   :  { %2036 = shalt.err (!%p2033_p1)
}
 0x30d   :  { %1470 = dma.vmem_to_hbm [thread:$0]  %s1465_s30, 640, %s2251_s7, [#allocation4], %s2062_s0, %s2062_s0, %s2063_s26  }
 0x30e   :  { %2051 = dma.done.wait [#allocation4], 640  }
 0x30f   :  { %2052 = vsyncadd [#allocation4], 4294966656 }
 0x310   :  { %1474 = vsyncpa [#allocation3], 1 }
 0x311   :  { %1475 = vsyncpa [#allocation6], 1 }
 0x312   :  { %1476 = vsyncpa [#allocation9], 1 }
 0x313   :  { %1477 = vsyncpa [#allocation4], 1 }

</bundles_post_ra>
